<compile_context>
chip_gen: v5e
topology: v5e:2x2
jax: 0.10.0
libtpu: 0.0.40
codegen_flags: <defaults>
</compile_context>

<pallas_src>
import math

import jax
import jax.numpy as jnp
from jax.experimental import pallas as pl
from jax.experimental.pallas import tpu as pltpu


_LANE = 128                       # lane width in elements
_DMA_MIN_SEG_BYTES = 512          # route to direct HBM->HBM DMA above this


def _vmem_caps():
    """(working-set budget, compiler scoped-VMEM limit), generation-aware."""
    try:
        cap = int(pltpu.get_tpu_info().vmem_capacity_bytes)
    except Exception:
        cap = 64 * 1024 * 1024    # conservative fallback (v7x-sized VMEM)
    budget = max(8 << 20, int(cap * 0.45))   # double-buffered in + out tiles
    limit = max(budget, int(cap * 0.70))     # headroom for internal scratch
    return budget, limit


def _rows_per_vreg(itemsize: int) -> int:
    """Sublane packing: 8 rows for f32, 16 for bf16, 32 for int8/fp8."""
    return max(8, (8 * 4) // max(int(itemsize), 1))


def _offsets(sizes):
    offs, off = [], 0
    for s in sizes:
        offs.append(off)
        off += s
    return offs


# ---------------------------------------------------------------------------
# Path 1: direct HBM -> HBM DMA (no VMEM staging, no grid).
# ---------------------------------------------------------------------------
def _make_dma_concat_kernel(sizes):
    offsets = _offsets(sizes)
    n = len(sizes)

    def kernel(*refs):
        in_refs = refs[:n]
        out_ref = refs[n]
        sem = refs[n + 1]
        copies = []
        for k, (ref, o, s) in enumerate(zip(in_refs, offsets, sizes)):
            cp = pltpu.make_async_copy(ref, out_ref.at[:, o:o + s], sem.at[k])
            cp.start()
            copies.append(cp)
        for cp in copies:          # all DMAs in flight; now drain them
            cp.wait()

    return kernel


def _concat2d_dma(flat, sizes, n_rows, total_e, dtype, cost):
    return pl.pallas_call(
        _make_dma_concat_kernel(sizes),
        out_shape=jax.ShapeDtypeStruct((n_rows, total_e), dtype),
        in_specs=[pl.BlockSpec(memory_space=pl.ANY) for _ in sizes],
        out_specs=pl.BlockSpec(memory_space=pl.ANY),
        scratch_shapes=[pltpu.SemaphoreType.DMA((len(sizes),))],
        cost_estimate=cost,
    )(*flat)


# ---------------------------------------------------------------------------
# Path 2: VMEM-tiled copy for many tiny, lane-aligned segments.
# ---------------------------------------------------------------------------
def _make_vmem_concat_kernel(sizes):
    offsets = _offsets(sizes)
    n = len(sizes)

    def kernel(*refs):
        out_ref = refs[n]
        # Segment sizes/offsets are multiples of 128 -> static, lane-aligned
        # slices -> unmasked full-vreg stores.
        for ref, o, s in zip(refs[:n], offsets, sizes):
            out_ref[:, o:o + s] = ref[...]

    return kernel


def _concat2d_vmem(flat, sizes, n_rows, total_e, dtype, cost):
    itemsize = jnp.dtype(dtype).itemsize
    sublane = _rows_per_vreg(itemsize)
    budget, limit = _vmem_caps()
    per_row = 4 * total_e * itemsize          # 2x (in + out), double-buffered

    if n_rows <= sublane:
        tile = n_rows                          # full-dim block: rule-safe
    else:
        tile = (budget // per_row) // sublane * sublane
        if tile < sublane:
            return None
        tile = min(tile, n_rows)
        # NOTE: no n_rows//2 "megacore split" -- on single-TC v5e/v6e it only
        # adds a grid step, and a pure copy already saturates HBM on v7x.
    if tile * per_row > budget:
        return None

    grid = (pl.cdiv(n_rows, tile),)
    return pl.pallas_call(
        _make_vmem_concat_kernel(sizes),
        out_shape=jax.ShapeDtypeStruct((n_rows, total_e), dtype),
        grid=grid,
        in_specs=[pl.BlockSpec((tile, s), lambda i: (i, 0)) for s in sizes],
        out_specs=pl.BlockSpec((tile, total_e), lambda i: (i, 0)),
        compiler_params=pltpu.CompilerParams(
            dimension_semantics=("parallel",),
            vmem_limit_bytes=limit,
        ),
        cost_estimate=cost,
    )(*flat)


# ---------------------------------------------------------------------------
# Wrapper: torch.cat(tensors, dim) semantics.
# ---------------------------------------------------------------------------
def concat(tensors, dim: int = 1) -> jax.Array:
    tensors = list(tensors)
    assert len(tensors) >= 1, "cat of an empty list is undefined"

    nd = tensors[0].ndim
    d = dim % nd
    dtype = tensors[0].dtype

    tensors_all = tensors
    # Drop zero-width inputs: they contribute nothing and would create
    # zero-width slices / DMAs inside the kernel.
    tensors = [t for t in tensors if t.shape[d] != 0]
    if not tensors:
        return jnp.concatenate(tensors_all, axis=d)
    if len(tensors) == 1:
        return tensors[0]

    lead = tensors[0].shape[:d]
    tail = tensors[0].shape[d + 1:]
    for t in tensors:
        assert t.ndim == nd and t.dtype == dtype
        assert t.shape[:d] == lead and t.shape[d + 1:] == tail, (
            "all dims except the concat dim must match")

    n_rows = math.prod(lead) if lead else 1
    post = math.prod(tail) if tail else 1
    sizes = [int(t.shape[d]) * post for t in tensors]
    total_e = sum(sizes)

    if n_rows == 0 or total_e == 0:
        return jnp.concatenate(tensors_all, axis=d)

    itemsize = jnp.dtype(dtype).itemsize
    flat = [t.reshape(n_rows, s) for t, s in zip(tensors, sizes)]
    cost = pl.CostEstimate(flops=0, transcendentals=0,
                           bytes_accessed=2 * n_rows * total_e * itemsize)

    min_seg_bytes = min(sizes) * itemsize
    lane_aligned = all(s % _LANE == 0 for s in sizes)

    out2d = None
    if min_seg_bytes < _DMA_MIN_SEG_BYTES and lane_aligned:
        # Many tiny but lane-aligned segments: tiled VMEM copy avoids a flood
        # of tiny strided DMA descriptors while keeping stores unmasked.
        out2d = _concat2d_vmem(flat, sizes, n_rows, total_e, dtype, cost)

    if out2d is None:
        if min_seg_bytes >= _DMA_MIN_SEG_BYTES or lane_aligned:
            out2d = _concat2d_dma(flat, sizes, n_rows, total_e, dtype, cost)
        else:
            # TODO(synk): tiny misaligned segments (<128-elem, non-lane-multiple)
            # could use a pad-to-128 copy kernel; use XLA concat for now.
            return jnp.concatenate(tensors_all, axis=d)

    out_dim = sum(int(t.shape[d]) for t in tensors)
    return out2d.reshape(lead + (out_dim,) + tail)


class Concat:
    """JAX mirror of the PyTorch Concat module."""

    def __init__(self, dimension: int = 1):
        self.d = dimension

    def __call__(self, x):
        return concat(x, dim=self.d)


if __name__ == "__main__":
    key = jax.random.PRNGKey(0)
    k1, k2, k3, k4, k5 = jax.random.split(key, 5)

    # NCHW feature maps, channel concat (the detector use-case) -> DMA path.
    N, C1, C2, H, W = 2, 4, 6, 16, 16
    a = jax.random.normal(k1, (N, C1, H, W), dtype=jnp.float32)
    b = jax.random.normal(k2, (N, C2, H, W), dtype=jnp.float32)

    module = Concat(dimension=1)
    out = jax.block_until_ready(module([a, b]))
    ref = jnp.concatenate([a, b], axis=1)
    assert out.shape == (N, C1 + C2, H, W), out.shape
    assert out.dtype == a.dtype
    assert jnp.array_equal(out, ref), "2-input mismatch vs reference"

    # Three-way concat: one DMA + semaphore per input.
    c = jax.random.normal(k3, (N, 2, H, W), dtype=jnp.float32)
    out3 = jax.block_until_ready(module([a, b, c]))
    ref3 = jnp.concatenate([a, b, c], axis=1)
    assert out3.shape == (N, C1 + C2 + 2, H, W)
    assert jnp.array_equal(out3, ref3), "3-input mismatch vs reference"

    # Tiny lane-aligned bf16 segments -> VMEM-tiled path (16-row sublane tile).
    p = jax.random.normal(k4, (16, 128), dtype=jnp.bfloat16)
    q = jax.random.normal(k5, (16, 128), dtype=jnp.bfloat16)
    out_small = jax.block_until_ready(concat([p, q], dim=1))
    ref_small = jnp.concatenate([p, q], axis=1)
    assert out_small.shape == (16, 256) and out_small.dtype == jnp.bfloat16
    assert jnp.array_equal(out_small, ref_small), "bf16 mismatch vs reference"

    print("KERNEL_OK")
</pallas_src>

<mosaic_0001>
module attributes {stable_mosaic.version = 11 : i64} {
  func.func @kernel(%arg0: memref<2x1024xf32, #tpu.memory_space<any>>, %arg1: memref<2x1536xf32, #tpu.memory_space<any>>, %arg2: memref<2x2560xf32, #tpu.memory_space<any>>, %arg3: memref<2x!tpu.dma_semaphore, #tpu.memory_space<semaphore_mem>>) attributes {dimension_semantics = [], scalar_prefetch = 0 : i64, scratch_operands = 1 : i64, tpu.core_type = #tpu.core_type<tc>} {
    %c0_i32 = arith.constant 0 : i32
    %c0_i32_0 = arith.constant 0 : i32
    %c0_i32_1 = arith.constant 0 : i32
    %0 = tpu.memref_slice %arg2[%c0_i32_0, %c0_i32_1] : memref<2x2560xf32, #tpu.memory_space<any>> -> memref<2x1024xf32, #tpu.memory_space<any>>
    %1 = tpu.memref_slice %arg3[%c0_i32] : memref<2x!tpu.dma_semaphore, #tpu.memory_space<semaphore_mem>> -> memref<1x!tpu.dma_semaphore, #tpu.memory_space<semaphore_mem>>
    %2 = tpu.memref_squeeze %1 : memref<1x!tpu.dma_semaphore, #tpu.memory_space<semaphore_mem>> -> memref<!tpu.dma_semaphore, #tpu.memory_space<semaphore_mem>>
    tpu.enqueue_dma source(%arg0 : memref<2x1024xf32, #tpu.memory_space<any>>) target(%0 : memref<2x1024xf32, #tpu.memory_space<any>>) target_semaphore(%2 : memref<!tpu.dma_semaphore, #tpu.memory_space<semaphore_mem>>)
    %c1_i32 = arith.constant 1 : i32
    %c0_i32_2 = arith.constant 0 : i32
    %c1024_i32 = arith.constant 1024 : i32
    %3 = tpu.memref_slice %arg2[%c0_i32_2, %c1024_i32] : memref<2x2560xf32, #tpu.memory_space<any>> -> memref<2x1536xf32, #tpu.memory_space<any>>
    %4 = tpu.memref_slice %arg3[%c1_i32] : memref<2x!tpu.dma_semaphore, #tpu.memory_space<semaphore_mem>> -> memref<1x!tpu.dma_semaphore, #tpu.memory_space<semaphore_mem>>
    %5 = tpu.memref_squeeze %4 : memref<1x!tpu.dma_semaphore, #tpu.memory_space<semaphore_mem>> -> memref<!tpu.dma_semaphore, #tpu.memory_space<semaphore_mem>>
    tpu.enqueue_dma source(%arg1 : memref<2x1536xf32, #tpu.memory_space<any>>) target(%3 : memref<2x1536xf32, #tpu.memory_space<any>>) target_semaphore(%5 : memref<!tpu.dma_semaphore, #tpu.memory_space<semaphore_mem>>)
    %c0_i32_3 = arith.constant 0 : i32
    %c0_i32_4 = arith.constant 0 : i32
    %c0_i32_5 = arith.constant 0 : i32
    %6 = tpu.memref_slice %arg2[%c0_i32_4, %c0_i32_5] : memref<2x2560xf32, #tpu.memory_space<any>> -> memref<2x1024xf32, #tpu.memory_space<any>>
    %7 = tpu.memref_slice %arg3[%c0_i32_3] : memref<2x!tpu.dma_semaphore, #tpu.memory_space<semaphore_mem>> -> memref<1x!tpu.dma_semaphore, #tpu.memory_space<semaphore_mem>>
    %8 = tpu.memref_squeeze %7 : memref<1x!tpu.dma_semaphore, #tpu.memory_space<semaphore_mem>> -> memref<!tpu.dma_semaphore, #tpu.memory_space<semaphore_mem>>
    tpu.wait_dma2 semaphore(%8 : memref<!tpu.dma_semaphore, #tpu.memory_space<semaphore_mem>>) src(%arg0 : memref<2x1024xf32, #tpu.memory_space<any>>) dst(%6 : memref<2x1024xf32, #tpu.memory_space<any>>)
    %c1_i32_6 = arith.constant 1 : i32
    %c0_i32_7 = arith.constant 0 : i32
    %c1024_i32_8 = arith.constant 1024 : i32
    %9 = tpu.memref_slice %arg2[%c0_i32_7, %c1024_i32_8] : memref<2x2560xf32, #tpu.memory_space<any>> -> memref<2x1536xf32, #tpu.memory_space<any>>
    %10 = tpu.memref_slice %arg3[%c1_i32_6] : memref<2x!tpu.dma_semaphore, #tpu.memory_space<semaphore_mem>> -> memref<1x!tpu.dma_semaphore, #tpu.memory_space<semaphore_mem>>
    %11 = tpu.memref_squeeze %10 : memref<1x!tpu.dma_semaphore, #tpu.memory_space<semaphore_mem>> -> memref<!tpu.dma_semaphore, #tpu.memory_space<semaphore_mem>>
    tpu.wait_dma2 semaphore(%11 : memref<!tpu.dma_semaphore, #tpu.memory_space<semaphore_mem>>) src(%arg1 : memref<2x1536xf32, #tpu.memory_space<any>>) dst(%9 : memref<2x1536xf32, #tpu.memory_space<any>>)
    return
  }
}

</mosaic_0001>

<bundles_post_ra>
// kernel: tpu_custom_call.1
= control target key start
LH: loop header
LB: loop body
LE: loop exit
PB: predicated region body
PF: predicated region fallthrough
CT: control target
= control target key end

     0   :  { %s62_s18 = smov [#allocation2]   ;;  %s63_s19 = smov [#allocation3]   ;;  %s94_s0 = inlined_call_operand.hbm [shape: f32[2,1024], index: 0, kind: input, shape index: {}]   ;;  %s95_s2 = inlined_call_operand.hbm [shape: f32[2,2560], index: 2, kind: output, shape index: {}]   ;;  %s96_s1 = inlined_call_operand.hbm [shape: f32[2,1536], index: 1, kind: input, shape index: {}]  }
   0x1   :  { %s11_s11 = sshll.u32 %s94_s0, 4  ;;  %s13_s14 = sshll.u32 %s95_s2, 4  ;;  %s12_s11 = int_to_ptr.hbm [resolvable:$true] %s11_s11  ;;  %s14_s14 = int_to_ptr.hbm [resolvable:$true] %s13_s14 }
   0x2   :  { %s18_s17 = scalar_lea.hbm %s95_s2, 16  ;;  %s64_s20 = smov 0  }
   0x3   :  { %17 = dma.general %s12_s11, 256, %s14_s14, %s62_s18, %s63_s19, [#allocation4], %s64_s20, 0  }
   0x4   :  { %s26_s21 = sshll.u32 %s18_s17, 4  ;;  %s24_s24 = sshll.u32 %s96_s1, 4  ;;  %s25_s24 = int_to_ptr.hbm [resolvable:$true] %s24_s24  ;;  %s27_s21 = int_to_ptr.hbm [resolvable:$true] %s26_s21 }
   0x5   :  { %s65_s0 = smov [#allocation2 + $0x1]   ;;  %s66_s25 = smov [#allocation5]  }
   0x6   :  { %30 = dma.general %s25_s24, 384, %s27_s21, %s65_s0, %s66_s25, [#allocation6], %s64_s20, 0  }
   0x7   :  { %58 = dma.done.wait [#allocation2], 256 }
   0x8   :  { %59 = vsyncadd [#allocation2], 4294967040 }
   0x9   :  { %60 = dma.done.wait [#allocation2 + $0x1], 384 }
   0xa   :  { %61 = vsyncadd [#allocation2 + $0x1], 4294966912 }
   0xb   :  { %38 = vsyncmov [#allocation2] }
   0xe   :  { %s39_s2 = vpop.sfrf %38 }
   0xf   :  { %p51_p0 = scmp.ne.s32.totalorder %s39_s2, 0 }
  0x11   :  { %43 = shalt.err (%p51_p0)  }
  0x12   :  { %45 = vsyncmov [#allocation2 + $0x1] }
  0x15   :  { %s46_s26 = vpop.sfrf %45 }
  0x16   :  { %p52_p1 = scmp.ne.s32.totalorder %s46_s26, 0 }
  0x18   :  { %50 = shalt.err (%p52_p1)  }

</bundles_post_ra>
